<compile_context>
chip_gen: v6e
topology: v6e:2x2x1
jax: 0.10.0
libtpu: 0.0.40
codegen_flags: <defaults>
</compile_context>

<pallas_src>
import jax
import jax.numpy as jnp
from jax.experimental import pallas as pl
from jax.experimental.pallas import tpu as pltpu

LANE = 128
DEFAULT_TILE = 512
VMEM_LIMIT = 32 * 1024 * 1024  # safe on v5e/v6e (128 MiB phys) and v7x (64 MiB phys)


def _round_up(x, m):
    return ((x + m - 1) // m) * m


# -----------------------------------------------------------------------------
# One GIN layer: agg = (A+I) @ x  (tiled reduction, bf16 operands, f32 acc),
# then the GIN MLP + ReLU activation on the finalize step.
# -----------------------------------------------------------------------------
def gin_layer_kernel(a_ref, x_ref, w1_ref, b1_ref, w2_ref, b2_ref, z_ref, acc_ref):
    k = pl.program_id(1)

    @pl.when(k == 0)
    def _init():
        acc_ref[...] = jnp.zeros_like(acc_ref)

    # Neighbor aggregation (incl. self term via A+I): bf16 MXU matmul, f32 accumulation.
    acc_ref[...] += jnp.dot(
        a_ref[...], x_ref[...].astype(jnp.bfloat16),
        preferred_element_type=jnp.float32)

    @pl.when(k == pl.num_programs(1) - 1)
    def _finalize():
        agg = acc_ref[...]
        h = jnp.dot(agg, w1_ref[...], preferred_element_type=jnp.float32) + b1_ref[...]
        h = jnp.maximum(h, 0.0)
        h = jnp.dot(h, w2_ref[...], preferred_element_type=jnp.float32) + b2_ref[...]
        z_ref[...] = jnp.maximum(h, 0.0).astype(z_ref.dtype)


def gin_layer(a_bf16, x, w1, b1, w2, b2, tile_m, tile_k):
    Np = a_bf16.shape[0]
    Fp = x.shape[1]
    Hp = w1.shape[1]
    grid = (Np // tile_m, Np // tile_k)

    flops = 2 * Np * Np * Fp + 2 * Np * Fp * Hp + 2 * Np * Hp * Hp
    bytes_accessed = (Np * Np * 2                     # bf16 adjacency stream
                      + grid[0] * Np * Fp * 4         # x re-streamed per row tile
                      + (Fp * Hp + Hp * Hp + 2 * Hp) * 4
                      + Np * Hp * 4)                  # z writeback

    return pl.pallas_call(
        gin_layer_kernel,
        out_shape=jax.ShapeDtypeStruct((Np, Hp), jnp.float32),
        grid_spec=pltpu.PrefetchScalarGridSpec(
            num_scalar_prefetch=0,
            grid=grid,
            in_specs=[
                pl.BlockSpec((tile_m, tile_k), lambda i, k: (i, k)),   # (A+I) tile, bf16
                pl.BlockSpec((tile_k, Fp),     lambda i, k: (k, 0)),   # x tile
                pl.BlockSpec((Fp, Hp),         lambda i, k: (0, 0)),   # W1 (resident)
                pl.BlockSpec((1, Hp),          lambda i, k: (0, 0)),   # b1
                pl.BlockSpec((Hp, Hp),         lambda i, k: (0, 0)),   # W2
                pl.BlockSpec((1, Hp),          lambda i, k: (0, 0)),   # b2
            ],
            out_specs=pl.BlockSpec((tile_m, Hp), lambda i, k: (i, 0)),
            scratch_shapes=[pltpu.VMEM((tile_m, Hp), jnp.float32)],
        ),
        compiler_params=pltpu.CompilerParams(
            dimension_semantics=("parallel", "arbitrary"),
            vmem_limit_bytes=VMEM_LIMIT),
        cost_estimate=pl.CostEstimate(
            flops=flops, transcendentals=0, bytes_accessed=bytes_accessed),
    )(a_bf16, x, w1, b1, w2, b2)


# -----------------------------------------------------------------------------
# global_add_pool over the final layer only: g = pool_mat @ z (tiled reduction).
# -----------------------------------------------------------------------------
def pool_kernel(pool_ref, z_ref, g_ref):
    @pl.when(pl.program_id(0) == 0)
    def _init():
        g_ref[...] = jnp.zeros_like(g_ref)

    g_ref[...] += jnp.dot(pool_ref[...], z_ref[...],
                          preferred_element_type=jnp.float32)


def global_add_pool(pool_mat, z, tile_k):
    Gp, Np = pool_mat.shape
    Hp = z.shape[1]
    return pl.pallas_call(
        pool_kernel,
        out_shape=jax.ShapeDtypeStruct((Gp, Hp), jnp.float32),
        grid_spec=pltpu.PrefetchScalarGridSpec(
            num_scalar_prefetch=0,
            grid=(Np // tile_k,),
            in_specs=[
                pl.BlockSpec((Gp, tile_k), lambda k: (0, k)),
                pl.BlockSpec((tile_k, Hp), lambda k: (k, 0)),
            ],
            out_specs=pl.BlockSpec((Gp, Hp), lambda k: (0, 0)),
        ),
        compiler_params=pltpu.CompilerParams(
            dimension_semantics=("arbitrary",),
            vmem_limit_bytes=VMEM_LIMIT),
    )(pool_mat, z)


# -----------------------------------------------------------------------------
# Parameter init (shapes mirror GConv.__init__ for gnn='GIN').
# -----------------------------------------------------------------------------
def init_gconv_params(key, input_dim, hidden_dim, num_layers):
    params = []
    for i in range(num_layers):
        d_in = input_dim if i == 0 else hidden_dim
        key, k1, k2, k3, k4 = jax.random.split(key, 5)
        w1 = jax.random.normal(k1, (d_in, hidden_dim), jnp.float32) * (1.0 / jnp.sqrt(d_in))
        b1 = jax.random.normal(k2, (1, hidden_dim), jnp.float32) * 0.01
        w2 = jax.random.normal(k3, (hidden_dim, hidden_dim), jnp.float32) * (1.0 / jnp.sqrt(hidden_dim))
        b2 = jax.random.normal(k4, (1, hidden_dim), jnp.float32) * 0.01
        params.append((w1, b1, w2, b2))
    return params


# -----------------------------------------------------------------------------
# Forward pass mirroring GConv.forward (returns (z_last, global_add_pool(z_last))).
# -----------------------------------------------------------------------------
def gconv_forward(params, x, edge_index, batch, num_graphs, tile=DEFAULT_TILE):
    N, Fin = x.shape
    H = params[0][0].shape[1]

    # Padded sizes: nodes to the tile size (lane-width multiple), features/hidden to 128.
    n128 = _round_up(N, LANE)
    tile_n = min(tile, n128)
    Np = _round_up(N, tile_n)
    Fp = _round_up(Fin, LANE)
    Hp = _round_up(H, LANE)
    Gp = _round_up(num_graphs, 8)

    src, dst = edge_index[0], edge_index[1]
    # (A + I): message flows source -> target; the identity carries the GIN self term (eps=0).
    adj = jnp.zeros((N, N), jnp.float32).at[dst, src].add(1.0) + jnp.eye(N, dtype=jnp.float32)
    # bf16 adjacency stream (small integer counts are exact in bf16); zero-padded rows/cols
    # never contaminate real rows, so padded node activations stay harmless garbage.
    a = jnp.zeros((Np, Np), jnp.bfloat16).at[:N, :N].set(adj.astype(jnp.bfloat16))

    z = jnp.zeros((Np, Fp), jnp.float32).at[:N, :Fin].set(x)

    pool_mat = (batch[None, :] == jnp.arange(num_graphs)[:, None]).astype(jnp.float32)
    pool_pad = jnp.zeros((Gp, Np), jnp.float32).at[:num_graphs, :N].set(pool_mat)

    for li, (w1, b1, w2, b2) in enumerate(params):
        d_in = w1.shape[0]
        d_in_p = Fp if li == 0 else Hp
        # Zero padding of weights/biases keeps padded feature columns exactly zero.
        w1p = jnp.zeros((d_in_p, Hp), jnp.float32).at[:d_in, :H].set(w1)
        b1p = jnp.zeros((1, Hp), jnp.float32).at[:, :H].set(b1)
        w2p = jnp.zeros((Hp, Hp), jnp.float32).at[:H, :H].set(w2)
        b2p = jnp.zeros((1, Hp), jnp.float32).at[:, :H].set(b2)
        z = gin_layer(a, z, w1p, b1p, w2p, b2p, tile_n, tile_n)

    g = global_add_pool(pool_pad, z, tile_n)
    return z[:N, :H], g[:num_graphs, :H]


# -----------------------------------------------------------------------------
# Pure-JAX f32 reference for correctness checking.
# -----------------------------------------------------------------------------
def gconv_reference(params, x, edge_index, batch, num_graphs):
    N = x.shape[0]
    src, dst = edge_index[0], edge_index[1]
    adj = jnp.zeros((N, N), jnp.float32).at[dst, src].add(1.0)
    pool_mat = (batch[None, :] == jnp.arange(num_graphs)[:, None]).astype(jnp.float32)
    z = x
    gs = []
    for (w1, b1, w2, b2) in params:
        agg = z + adj @ z
        h = jnp.maximum(agg @ w1 + b1, 0.0) @ w2 + b2
        z = jnp.maximum(h, 0.0)
        gs.append(pool_mat @ z)
    return z, gs[-1]


def _make_example(key, num_nodes, input_dim, num_edges, split):
    key, kx, ke = jax.random.split(key, 3)
    x = jax.random.normal(kx, (num_nodes, input_dim), jnp.float32)
    src = jax.random.randint(ke, (num_edges,), 0, num_nodes)
    dst = (src + 1 + jax.random.randint(jax.random.fold_in(ke, 1),
                                        (num_edges,), 0, num_nodes - 1)) % num_nodes
    edge_index = jnp.stack([src, dst]).astype(jnp.int32)
    batch = jnp.concatenate([jnp.zeros(split, jnp.int32),
                             jnp.ones(num_nodes - split, jnp.int32)])
    return key, x, edge_index, batch


if __name__ == "__main__":
    key = jax.random.PRNGKey(0)
    input_dim, hidden_dim, num_layers, num_graphs = 8, 32, 2, 2

    # --- Test 1: tiny graph batch (2 graphs, 16 nodes) -> single-tile grid. ---
    key, x1, ei1, b1 = _make_example(key, num_nodes=16, input_dim=input_dim,
                                     num_edges=24, split=8)
    params = init_gconv_params(key, input_dim, hidden_dim, num_layers)

    z1, g1 = gconv_forward(params, x1, ei1, b1, num_graphs)
    jax.block_until_ready((z1, g1))
    z1_ref, g1_ref = gconv_reference(params, x1, ei1, b1, num_graphs)
    assert z1.shape == (16, hidden_dim) and g1.shape == (num_graphs, hidden_dim)
    assert jnp.allclose(z1, z1_ref, atol=2e-2, rtol=2e-2)
    assert jnp.allclose(g1, g1_ref, atol=2e-2, rtol=2e-2)

    # --- Test 2: 200 nodes with tile=128 -> 2x2 grid, exercises the row-parallel
    #     axis and the k-reduction accumulator (pl.when init / finalize). ---
    key, x2, ei2, b2 = _make_example(key, num_nodes=200, input_dim=input_dim,
                                     num_edges=400, split=96)
    z2, g2 = gconv_forward(params, x2, ei2, b2, num_graphs, tile=128)
    jax.block_until_ready((z2, g2))
    z2_ref, g2_ref = gconv_reference(params, x2, ei2, b2, num_graphs)
    assert z2.shape == (200, hidden_dim) and g2.shape == (num_graphs, hidden_dim)
    assert jnp.allclose(z2, z2_ref, atol=2e-2, rtol=2e-2)
    assert jnp.allclose(g2, g2_ref, atol=2e-2, rtol=2e-2)

    print("KERNEL_OK")
</pallas_src>

<mosaic_0001>
module attributes {stable_mosaic.version = 11 : i64} {
  func.func @gin_layer_kernel(%arg0: i32, %arg1: i32, %arg2: memref<128x128xbf16, #tpu.memory_space<vmem>>, %arg3: memref<128x128xf32, #tpu.memory_space<vmem>>, %arg4: memref<128x128xf32, #tpu.memory_space<vmem>>, %arg5: memref<1x128xf32, #tpu.memory_space<vmem>>, %arg6: memref<128x128xf32, #tpu.memory_space<vmem>>, %arg7: memref<1x128xf32, #tpu.memory_space<vmem>>, %arg8: memref<128x128xf32, #tpu.memory_space<vmem>>, %arg9: memref<128x128xf32, #tpu.memory_space<vmem>>) attributes {dimension_semantics = [#tpu.dimension_semantics<parallel>, #tpu.dimension_semantics<arbitrary>], iteration_bounds = array<i64: 1, 1>, scalar_prefetch = 0 : i64, scratch_operands = 1 : i64, tpu.core_type = #tpu.core_type<tc>, window_params = [{transform_indices = @transform_0, window_bounds = array<i64: 128, 128>}, {transform_indices = @transform_1, window_bounds = array<i64: 128, 128>}, {pipeline_mode = #tpu.pipeline_mode<synchronous>, transform_indices = @transform_2, window_bounds = array<i64: 128, 128>}, {pipeline_mode = #tpu.pipeline_mode<synchronous>, transform_indices = @transform_3, window_bounds = array<i64: 1, 128>}, {pipeline_mode = #tpu.pipeline_mode<synchronous>, transform_indices = @transform_4, window_bounds = array<i64: 128, 128>}, {pipeline_mode = #tpu.pipeline_mode<synchronous>, transform_indices = @transform_5, window_bounds = array<i64: 1, 128>}, {transform_indices = @transform_6, window_bounds = array<i64: 128, 128>}]} {
    %c0_i32 = arith.constant 0 : i32
    %0 = arith.cmpi eq, %arg1, %c0_i32 : i32
    %1 = arith.extui %0 : i1 to i32
    %c0_i32_0 = arith.constant 0 : i32
    %2 = arith.cmpi ne, %1, %c0_i32_0 : i32
    scf.if %2 {
      %cst_10 = arith.constant 0.000000e+00 : f32
      %13 = vector.broadcast %cst_10 : f32 to vector<128x128xf32>
      %c0_11 = arith.constant 0 : index
      %c0_12 = arith.constant 0 : index
      %14 = vector.load %arg9[%c0_11, %c0_12] : memref<128x128xf32, #tpu.memory_space<vmem>>, vector<128x128xf32>
      tpu.vector_store %arg9[%c0_11, %c0_12], %13 {strides = array<i32>} : memref<128x128xf32, #tpu.memory_space<vmem>>, vector<128x128xf32>,
    } else {
    }
    %c0 = arith.constant 0 : index
    %c0_1 = arith.constant 0 : index
    %3 = vector.load %arg9[%c0, %c0_1] : memref<128x128xf32, #tpu.memory_space<vmem>>, vector<128x128xf32>
    %c0_2 = arith.constant 0 : index
    %c0_3 = arith.constant 0 : index
    %4 = vector.load %arg2[%c0_2, %c0_3] : memref<128x128xbf16, #tpu.memory_space<vmem>>, vector<128x128xbf16>
    %c0_4 = arith.constant 0 : index
    %c0_5 = arith.constant 0 : index
    %5 = vector.load %arg3[%c0_4, %c0_5] : memref<128x128xf32, #tpu.memory_space<vmem>>, vector<128x128xf32>
    %6 = arith.truncf %5 : vector<128x128xf32> to vector<128x128xbf16>
    %cst = arith.constant dense<0.000000e+00> : vector<128x128xf32>
    %7 = tpu.matmul %4, %6, %cst {dimension_numbers = #tpu.dot_dimension_numbers<[1], [0], [0], [1], [0, 0, 1, 1], [], []>} : vector<128x128xbf16>, vector<128x128xbf16>, vector<128x128xf32> -> vector<128x128xf32>
    %8 = arith.addf %3, %7 : vector<128x128xf32>
    %c0_6 = arith.constant 0 : index
    %c0_7 = arith.constant 0 : index
    %9 = vector.load %arg9[%c0_6, %c0_7] : memref<128x128xf32, #tpu.memory_space<vmem>>, vector<128x128xf32>
    tpu.vector_store %arg9[%c0_6, %c0_7], %8 {strides = array<i32>} : memref<128x128xf32, #tpu.memory_space<vmem>>, vector<128x128xf32>,
    %c0_i32_8 = arith.constant 0 : i32
    %10 = arith.cmpi eq, %arg1, %c0_i32_8 : i32
    %11 = arith.extui %10 : i1 to i32
    %c0_i32_9 = arith.constant 0 : i32
    %12 = arith.cmpi ne, %11, %c0_i32_9 : i32
    scf.if %12 {
      %c0_10 = arith.constant 0 : index
      %c0_11 = arith.constant 0 : index
      %13 = vector.load %arg9[%c0_10, %c0_11] : memref<128x128xf32, #tpu.memory_space<vmem>>, vector<128x128xf32>
      %c0_12 = arith.constant 0 : index
      %c0_13 = arith.constant 0 : index
      %14 = vector.load %arg4[%c0_12, %c0_13] : memref<128x128xf32, #tpu.memory_space<vmem>>, vector<128x128xf32>
      %cst_14 = arith.constant dense<0.000000e+00> : vector<128x128xf32>
      %15 = tpu.matmul %13, %14, %cst_14 {dimension_numbers = #tpu.dot_dimension_numbers<[1], [0], [0], [1], [0, 0, 1, 1], [], []>} : vector<128x128xf32>, vector<128x128xf32>, vector<128x128xf32> -> vector<128x128xf32>
      %c0_15 = arith.constant 0 : index
      %c0_16 = arith.constant 0 : index
      %16 = vector.load %arg5[%c0_15, %c0_16] : memref<1x128xf32, #tpu.memory_space<vmem>>, vector<1x128xf32>
      %17 = vector.broadcast %16 : vector<1x128xf32> to vector<128x128xf32>
      %18 = arith.addf %15, %17 : vector<128x128xf32>
      %cst_17 = arith.constant 0.000000e+00 : f32
      %19 = vector.broadcast %cst_17 : f32 to vector<128x128xf32>
      %20 = arith.maximumf %18, %19 : vector<128x128xf32>
      %c0_18 = arith.constant 0 : index
      %c0_19 = arith.constant 0 : index
      %21 = vector.load %arg6[%c0_18, %c0_19] : memref<128x128xf32, #tpu.memory_space<vmem>>, vector<128x128xf32>
      %cst_20 = arith.constant dense<0.000000e+00> : vector<128x128xf32>
      %22 = tpu.matmul %20, %21, %cst_20 {dimension_numbers = #tpu.dot_dimension_numbers<[1], [0], [0], [1], [0, 0, 1, 1], [], []>} : vector<128x128xf32>, vector<128x128xf32>, vector<128x128xf32> -> vector<128x128xf32>
      %c0_21 = arith.constant 0 : index
      %c0_22 = arith.constant 0 : index
      %23 = vector.load %arg7[%c0_21, %c0_22] : memref<1x128xf32, #tpu.memory_space<vmem>>, vector<1x128xf32>
      %24 = vector.broadcast %23 : vector<1x128xf32> to vector<128x128xf32>
      %25 = arith.addf %22, %24 : vector<128x128xf32>
      %cst_23 = arith.constant 0.000000e+00 : f32
      %26 = vector.broadcast %cst_23 : f32 to vector<128x128xf32>
      %27 = arith.maximumf %25, %26 : vector<128x128xf32>
      %c0_24 = arith.constant 0 : index
      %c0_25 = arith.constant 0 : index
      %28 = vector.load %arg8[%c0_24, %c0_25] : memref<128x128xf32, #tpu.memory_space<vmem>>, vector<128x128xf32>
      tpu.vector_store %arg8[%c0_24, %c0_25], %27 {strides = array<i32>} : memref<128x128xf32, #tpu.memory_space<vmem>>, vector<128x128xf32>,
    } else {
    }
    return
  }
  func.func @transform_0(%arg0: i32, %arg1: i32) -> (i32, i32) {
    %c0_i32 = arith.constant 0 : i32
    return %arg0, %arg1 : i32, i32
  }
  func.func @transform_1(%arg0: i32, %arg1: i32) -> (i32, i32) {
    %c0_i32 = arith.constant 0 : i32
    %c0_i32_0 = arith.constant 0 : i32
    return %arg1, %c0_i32 : i32, i32
  }
  func.func @transform_2(%arg0: i32, %arg1: i32) -> (i32, i32) {
    %c0_i32 = arith.constant 0 : i32
    %c0_i32_0 = arith.constant 0 : i32
    %c0_i32_1 = arith.constant 0 : i32
    return %c0_i32, %c0_i32_0 : i32, i32
  }
  func.func @transform_3(%arg0: i32, %arg1: i32) -> (i32, i32) {
    %c0_i32 = arith.constant 0 : i32
    %c0_i32_0 = arith.constant 0 : i32
    %c0_i32_1 = arith.constant 0 : i32
    return %c0_i32, %c0_i32_0 : i32, i32
  }
  func.func @transform_4(%arg0: i32, %arg1: i32) -> (i32, i32) {
    %c0_i32 = arith.constant 0 : i32
    %c0_i32_0 = arith.constant 0 : i32
    %c0_i32_1 = arith.constant 0 : i32
    return %c0_i32, %c0_i32_0 : i32, i32
  }
  func.func @transform_5(%arg0: i32, %arg1: i32) -> (i32, i32) {
    %c0_i32 = arith.constant 0 : i32
    %c0_i32_0 = arith.constant 0 : i32
    %c0_i32_1 = arith.constant 0 : i32
    return %c0_i32, %c0_i32_0 : i32, i32
  }
  func.func @transform_6(%arg0: i32, %arg1: i32) -> (i32, i32) {
    %c0_i32 = arith.constant 0 : i32
    %c0_i32_0 = arith.constant 0 : i32
    return %arg0, %c0_i32 : i32, i32
  }
}

</mosaic_0001>

<bundles_post_ra>
// kernel: tpu_custom_call.1
= control target key start
LH: loop header
LB: loop body
LE: loop exit
PB: predicated region body
PF: predicated region fallthrough
CT: control target
= control target key end

     0   :  { %11 = vsyncpa [#allocation4], 0  ;;  %s1241_s0 = inlined_call_operand.hbm [shape: bf16[128,128], index: 0, kind: input, shape index: {}]   ;;  %s1242_s1 = inlined_call_operand.hbm [shape: f32[128,128], index: 1, kind: input, shape index: {}]   ;;  %s1243_s2 = inlined_call_operand.hbm [shape: f32[128,128], index: 2, kind: input, shape index: {}]   ;;  %s1244_s3 = inlined_call_operand.vmem [shape: f32[1,128], index: 3, kind: input, shape index: {}]   ;;  %s1245_s4 = inlined_call_operand.hbm [shape: f32[128,128], index: 4, kind: input, shape index: {}]   ;;  %s1246_s5 = inlined_call_operand.vmem [shape: f32[1,128], index: 5, kind: input, shape index: {}]   ;;  %s1247_s6 = inlined_call_operand.hbm [shape: f32[128,128], index: 6, kind: output, shape index: {}]  }
   0x1   :  { %12 = vsyncpa [#allocation7], 0 }
   0x2   :  { %13 = vsyncpa [#allocation10], 0 }
   0x3   :  { %14 = vsyncpa [#allocation5], 0  ;;  %s1146_s21 = smov [#allocation6]  }
   0x4   :  { %s32_s22 = sshll.u32 %s1146_s21, 4  ;;  %s33_s22 = int_to_ptr.vmem [resolvable:$true] %s32_s22 }
   0x5   :  { %s1046_s23 = scalar_lea.vmem %s33_s22, 2048  ;;  %p1051_p1 = scmp.lt.s32.totalorder %s33_s22, %s33_s22 }
   0x6   :  { %p1047_p0 = scmp.ne.s32.totalorder %s33_s22, %s1046_s23  ;;  %p1052_p2 = scmp.lt.s32.totalorder %s1046_s23, %s1046_s23 }
   0x8   :  { %p1053_p3 = por %p1052_p2, %p1051_p1 }
   0xa   :  { %p1054_p4 = pnand %p1053_p3, %p1047_p0 }
   0xc   :  { %1057 = shalt.err (!%p1054_p4)
}
   0xd   :  { %s1147_s24 = smov 128   ;;  %s1148_s25 = smov 8  }
   0xe   :  { %38 = dma.hbm_to_vmem [thread:$0]  %s1242_s1, 2048, %s33_s22, [#allocation7], %s1147_s24, %s1147_s24, %s1148_s25  }
   0xf   :  { %s1149_s28 = smov [#allocation3]  }
  0x10   :  { %s20_s29 = sshll.u32 %s1149_s28, 4  ;;  %s21_s29 = int_to_ptr.vmem [resolvable:$true] %s20_s29 }
  0x11   :  { %s1066_s30 = scalar_lea.vmem %s21_s29, 1024  ;;  %p1071_p6 = scmp.lt.s32.totalorder %s21_s29, %s21_s29 }
  0x12   :  { %p1067_p5 = scmp.ne.s32.totalorder %s21_s29, %s1066_s30  ;;  %p1072_p7 = scmp.lt.s32.totalorder %s1066_s30, %s1066_s30 }
  0x14   :  { %p1073_p8 = por %p1072_p7, %p1071_p6 }
  0x16   :  { %p1074_p9 = pnand %p1073_p8, %p1067_p5 }
  0x18   :  { %1077 = shalt.err (!%p1074_p9)
}
  0x19   :  { %s1150_s7 = smov 64   ;;  %s1151_s8 = smov 4  }
  0x1a   :  { %26 = dma.hbm_to_vmem [thread:$0]  %s1241_s0, 1024, %s21_s29, [#allocation4], %s1150_s7, %s1150_s7, %s1151_s8  }
  0x1b   :  { %s1152_s11 = smov [#allocation8]   ;;  %s1153_s13 = smov [#allocation9]  }
  0x1c   :  { %s44_s12 = sshll.u32 %s1152_s11, 4  ;;  %s58_s1 = sshll.u32 %s1153_s13, 4  ;;  %s45_s12 = int_to_ptr.vmem [resolvable:$true] %s44_s12  ;;  %s59_s1 = int_to_ptr.vmem [resolvable:$true] %s58_s1 }
  0x1d   :  { %s1086_s14 = scalar_lea.vmem %s45_s12, 2048  ;;  %p1091_p11 = scmp.lt.s32.totalorder %s45_s12, %s45_s12 }
  0x1e   :  { %p1087_p10 = scmp.ne.s32.totalorder %s45_s12, %s1086_s14  ;;  %p1092_p12 = scmp.lt.s32.totalorder %s1086_s14, %s1086_s14 }
  0x20   :  { %p1093_p13 = por %p1092_p12, %p1091_p11 }
  0x22   :  { %p1094_p0 = pnand %p1093_p13, %p1087_p10 }
  0x24   :  { %1097 = shalt.err (!%p1094_p0)
}
  0x25   :  { %50 = dma.hbm_to_vmem [thread:$0]  %s1243_s2, 2048, %s45_s12, [#allocation7], %s1147_s24, %s1147_s24, %s1148_s25  }
  0x26   :  { %s1106_s0 = scalar_lea.vmem %s59_s1, 2048  ;;  %p1111_p2 = scmp.lt.s32.totalorder %s59_s1, %s59_s1 }
  0x27   :  { %p1107_p1 = scmp.ne.s32.totalorder %s59_s1, %s1106_s0  ;;  %p1112_p3 = scmp.lt.s32.totalorder %s1106_s0, %s1106_s0 }
  0x29   :  { %p1113_p4 = por %p1112_p3, %p1111_p2 }
  0x2b   :  { %p1114_p5 = pnand %p1113_p4, %p1107_p1 }
  0x2d   :  { %1117 = shalt.err (!%p1114_p5)
}
  0x2e   :  { %64 = dma.hbm_to_vmem [thread:$0]  %s1245_s4, 2048, %s59_s1, [#allocation10], %s1147_s24, %s1147_s24, %s1148_s25  }
  0x2f   :  { %1138 = dma.done.wait [#allocation4], 1024  }
  0x30   :  { %1139 = vsyncadd [#allocation4], 4294966272 }
  0x31   :  { %1140 = dma.done.wait [#allocation7], 4096  }
  0x32   :  { %1141 = vsyncadd [#allocation7], 4294963200 }
  0x33   :  { %1142 = dma.done.wait [#allocation10], 2048  }
  0x34   :  { %1143 = vsyncadd [#allocation10], 4294965248  ;;  %v146_v0 = vld [vmem:[#allocation6 + $0x70] sm:$0xff]  ;;  %v147_v1 = vld [vmem:[#allocation6 + $0x78] sm:$0xff] }
  0x35   :  { %v144_v2 = vld [vmem:[#allocation6 + $0x60] sm:$0xff]  ;;  %v155_v3 = vpack.c.bf16 %v147_v1, %v146_v0  ;;  %v145_v4 = vld [vmem:[#allocation6 + $0x68] sm:$0xff]  ;;  %v142_v6 = vld [vmem:[#allocation6 + $0x50] sm:$0xff] }
  0x36   :  { %v154_v5 = vpack.c.bf16 %v145_v4, %v144_v2  ;;  %v143_v7 = vld [vmem:[#allocation6 + $0x58] sm:$0xff]  ;;  %v140_v8 = vld [vmem:[#allocation6 + $0x40] sm:$0xff]  ;;  %v141_v10 = vld [vmem:[#allocation6 + $0x48] sm:$0xff] }
  0x37   :  { %845 = vmatprep.subr.bf16.mxu0 %v155_v3  ;;  %v153_v9 = vpack.c.bf16 %v143_v7, %v142_v6  ;;  %v1030_v11 = vld [vmem:[#allocation3] sm:$0xff]   ;;  %v152_v12 = vpack.c.bf16 %v141_v10, %v140_v8  ;;  %v138_v13 = vld [vmem:[#allocation6 + $0x30] sm:$0xff]  ;;  %v139_v14 = vld [vmem:[#allocation6 + $0x38] sm:$0xff] }
  0x38   :  { %846 = vmatpush3.bf16.msra.mxu0 %v155_v3  ;;  %861 = vmatprep.mubr.bf16.mxu0 %v1030_v11  ;;  %v151_v15 = vpack.c.bf16 %v139_v14, %v138_v13  ;;  %v367_v16 = vld [vmem:[#allocation8 + $0x78] sm:$0xff]  ;;  %v366_v17 = vld [vmem:[#allocation8 + $0x70] sm:$0xff]  ;;  %v136_v18 = vld [vmem:[#allocation6 + $0x20] sm:$0xff] }
  0x39   :  { %847 = vmatprep.subr.bf16.mxu0 %v154_v5  ;;  %v137_v19 = vld [vmem:[#allocation6 + $0x28] sm:$0xff]  ;;  %877 = vmatprep.subr.mxu1 %v367_v16  ;;  %v364_v22 = vld [vmem:[#allocation8 + $0x60] sm:$0xff]  ;;  %v134_v23 = vld [vmem:[#allocation6 + $0x10] sm:$0xff] }
  0x3a   :  { %878 = vmatpush3.msra.mxu1 %v367_v16  ;;  %v365_v20 = vld [vmem:[#allocation8 + $0x68] sm:$0xff]  ;;  %v150_v21 = vpack.c.bf16 %v137_v19, %v136_v18  ;;  %v135_v24 = vld [vmem:[#allocation6 + $0x18] sm:$0xff]  ;;  %v362_v27 = vld [vmem:[#allocation8 + $0x50] sm:$0xff] }
  0x3b   :  { %879 = vmatprep.subr.mxu1 %v366_v17  ;;  %v363_v25 = vld [vmem:[#allocation8 + $0x58] sm:$0xff]  ;;  %v149_v26 = vpack.c.bf16 %v135_v24, %v134_v23  ;;  %v132_v28 = vld [vmem:[#allocation6] sm:$0xff]  ;;  %v133_v29 = vld [vmem:[#allocation6 + $0x8] sm:$0xff] }
  0x3c   :  { %848 = vmatpush3.bf16.msra.mxu0 %v154_v5  ;;  %880 = vmatpush3.msra.mxu1 %v366_v17  ;;  %v361_v30 = vld [vmem:[#allocation8 + $0x48] sm:$0xff]  ;;  %v148_v31 = vpack.c.bf16 %v133_v29, %v132_v28  ;;  %v360_v32 = vld [vmem:[#allocation8 + $0x40] sm:$0xff]  ;;  %v359_v33 = vld [vmem:[#allocation8 + $0x38] sm:$0xff] }
  0x3d   :  { %849 = vmatprep.subr.bf16.mxu0 %v153_v9  ;;  %881 = vmatprep.subr.mxu1 %v365_v20  ;;  %v358_v34 = vld [vmem:[#allocation8 + $0x30] sm:$0xff]  ;;  %v1031_v35 = vld [vmem:[#allocation3 + $0x8] sm:$0xff]   ;;  %v356_v38 = vld [vmem:[#allocation8 + $0x20] sm:$0xff] }
  0x3e   :  { %882 = vmatpush3.msra.mxu1 %v365_v20  ;;  %v357_v36 = vld [vmem:[#allocation8 + $0x28] sm:$0xff]  ;;  %v1032_v37 = vld [vmem:[#allocation3 + $0x10] sm:$0xff]   ;;  %v355_v39 = vld [vmem:[#allocation8 + $0x18] sm:$0xff] }
  0x3f   :  { %883 = vmatprep.subr.mxu1 %v364_v22  ;;  %v1033_v40 = vld [vmem:[#allocation3 + $0x18] sm:$0xff]   ;;  %v1034_v41 = vld [vmem:[#allocation3 + $0x20] sm:$0xff]   ;;  %v1035_v42 = vld [vmem:[#allocation3 + $0x28] sm:$0xff]  }
  0x40   :  { %850 = vmatpush3.bf16.msra.mxu0 %v153_v9  ;;  %884 = vmatpush3.msra.mxu1 %v364_v22  ;;  %v1036_v43 = vld [vmem:[#allocation3 + $0x30] sm:$0xff]   ;;  %v1037_v44 = vld [vmem:[#allocation3 + $0x38] sm:$0xff]   ;;  %v353_v46 = vld [vmem:[#allocation8 + $0x8] sm:$0xff] }
  0x41   :  { %851 = vmatprep.subr.bf16.mxu0 %v152_v12  ;;  %885 = vmatprep.subr.mxu1 %v363_v25  ;;  %v354_v45 = vld [vmem:[#allocation8 + $0x10] sm:$0xff]  ;;  %v352_v47 = vld [vmem:[#allocation8] sm:$0xff]  ;;  %v551_v48 = vld [vmem:[#allocation9 + $0x78] sm:$0xff] }
  0x42   :  { %886 = vmatpush3.msra.mxu1 %v363_v25  ;;  %v550_v49 = vld [vmem:[#allocation9 + $0x70] sm:$0xff]  ;;  %v549_v50 = vld [vmem:[#allocation9 + $0x68] sm:$0xff]  ;;  %v548_v51 = vld [vmem:[#allocation9 + $0x60] sm:$0xff] }
  0x43   :  { %887 = vmatprep.subr.mxu1 %v362_v27  ;;  %v547_v52 = vld [vmem:[#allocation9 + $0x58] sm:$0xff]  ;;  %v546_v53 = vld [vmem:[#allocation9 + $0x50] sm:$0xff]  ;;  %v545_v54 = vld [vmem:[#allocation9 + $0x48] sm:$0xff] }
  0x44   :  { %852 = vmatpush3.bf16.msra.mxu0 %v152_v12  ;;  %888 = vmatpush3.msra.mxu1 %v362_v27  ;;  %v544_v55 = vld [vmem:[#allocation9 + $0x40] sm:$0xff]  ;;  %v543_v56 = vld [vmem:[#allocation9 + $0x38] sm:$0xff]  ;;  %v542_v57 = vld [vmem:[#allocation9 + $0x30] sm:$0xff] }
  0x45   :  { %853 = vmatprep.subr.bf16.mxu0 %v151_v15  ;;  %889 = vmatprep.subr.mxu1 %v361_v30  ;;  %v541_v58 = vld [vmem:[#allocation9 + $0x28] sm:$0xff]  ;;  %v540_v59 = vld [vmem:[#allocation9 + $0x20] sm:$0xff]  ;;  %v539_v12 = vld [vmem:[#allocation9 + $0x18] sm:$0xff] }
  0x46   :  { %890 = vmatpush3.msra.mxu1 %v361_v30  ;;  %v538_v13 = vld [vmem:[#allocation9 + $0x10] sm:$0xff]  ;;  %v537_v14 = vld [vmem:[#allocation9 + $0x8] sm:$0xff]  ;;  %v763_v16 = vld [vmem:[%s1244_s3] ss:$0 sm:$0xff] }
  0x47   :  { %891 = vmatprep.subr.mxu1 %v360_v32 }
  0x48   :  { %854 = vmatpush3.bf16.msra.mxu0 %v151_v15  ;;  %892 = vmatpush3.msra.mxu1 %v360_v32  ;;  %v536_v15 = vld [vmem:[#allocation9] sm:$0xff] }
  0x49   :  { %855 = vmatprep.subr.bf16.mxu0 %v150_v21  ;;  %893 = vmatprep.subr.mxu1 %v359_v33 }
  0x4a   :  { %894 = vmatpush3.msra.mxu1 %v359_v33 }
  0x4b   :  { %895 = vmatprep.subr.mxu1 %v358_v34 }
  0x4c   :  { %856 = vmatpush3.bf16.msra.mxu0 %v150_v21  ;;  %896 = vmatpush3.msra.mxu1 %v358_v34 }
  0x4d   :  { %857 = vmatprep.subr.bf16.mxu0 %v149_v26  ;;  %897 = vmatprep.subr.mxu1 %v357_v36 }
  0x4e   :  { %898 = vmatpush3.msra.mxu1 %v357_v36 }
  0x4f   :  { %899 = vmatprep.subr.mxu1 %v356_v38 }
  0x50   :  { %858 = vmatpush3.bf16.msra.mxu0 %v149_v26  ;;  %900 = vmatpush3.msra.mxu1 %v356_v38 }
  0x51   :  { %859 = vmatprep.subr.bf16.mxu0 %v148_v31  ;;  %901 = vmatprep.subr.mxu1 %v355_v39 }
  0x52   :  { %902 = vmatpush3.msra.mxu1 %v355_v39 }
  0x53   :  { %903 = vmatprep.subr.mxu1 %v354_v45 }
  0x54   :  { %860 = vmatpush3.bf16.msra.mxu0 %v148_v31  ;;  %904 = vmatpush3.msra.mxu1 %v354_v45 }
  0x55   :  { %905 = vmatprep.subr.mxu1 %v353_v46  ;;  %933 = vmatprep.subr.mxu0 %v551_v48 }
  0x56   :  { %906 = vmatpush3.msra.mxu1 %v353_v46 }
  0x57   :  { %862 = vmatmul.mubr.bf16.vlgmr.msra.gmra.mxu0 %v1031_v35  ;;  %907 = vmatprep.subr.mxu1 %v352_v47 }
  0x58   :  { %865 = vmatprep.mubr.bf16.mxu0 %v1032_v37  ;;  %908 = vmatpush3.msra.mxu1 %v352_v47 }
  0x59   :  { %989 = vmatprep.subr.mxu1 %v551_v48  ;;  %934 = vmatpush3.msra.mxu0 %v551_v48 }
  0x5a   :  { %935 = vmatprep.subr.mxu0 %v550_v49 }
  0x5b   :  { %936 = vmatpush3.msra.mxu0 %v550_v49 }
  0x5c   :  { %937 = vmatprep.subr.mxu0 %v549_v50 }
  0x5d   :  { %938 = vmatpush3.msra.mxu0 %v549_v50 }
  0x5e   :  { %939 = vmatprep.subr.mxu0 %v548_v51 }
  0x5f   :  { %866 = vmatmul.mubr.bf16.gmra.mxu0 %v1033_v40 }
  0x60   :  { %869 = vmatprep.mubr.bf16.mxu0 %v1034_v41  ;;  %940 = vmatpush3.msra.mxu0 %v548_v51 }
  0x61   :  { %941 = vmatprep.subr.mxu0 %v547_v52 }
  0x62   :  { %942 = vmatpush3.msra.mxu0 %v547_v52 }
  0x63   :  { %943 = vmatprep.subr.mxu0 %v546_v53 }
  0x64   :  { %944 = vmatpush3.msra.mxu0 %v546_v53 }
  0x65   :  { %945 = vmatprep.subr.mxu0 %v545_v54 }
  0x66   :  { %946 = vmatpush3.msra.mxu0 %v545_v54 }
  0x67   :  { %870 = vmatmul.mubr.bf16.gmra.mxu0 %v1035_v42  ;;  %947 = vmatprep.subr.mxu0 %v544_v55 }
  0x68   :  { %873 = vmatprep.mubr.bf16.mxu0 %v1036_v43  ;;  %948 = vmatpush3.msra.mxu0 %v544_v55 }
  0x69   :  { %949 = vmatprep.subr.mxu0 %v543_v56 }
  0x6a   :  { %950 = vmatpush3.msra.mxu0 %v543_v56 }
  0x6b   :  { %951 = vmatprep.subr.mxu0 %v542_v57 }
  0x6c   :  { %952 = vmatpush3.msra.mxu0 %v542_v57 }
  0x6d   :  { %953 = vmatprep.subr.mxu0 %v541_v58 }
  0x6e   :  { %954 = vmatpush3.msra.mxu0 %v541_v58 }
  0x6f   :  { %874 = vmatmul.mubr.bf16.gmra.mxu0 %v1037_v44  ;;  %955 = vmatprep.subr.mxu0 %v540_v59 }
  0x70   :  { %956 = vmatpush3.msra.mxu0 %v540_v59 }
  0x71   :  { %957 = vmatprep.subr.mxu0 %v539_v12 }
  0x72   :  { %958 = vmatpush3.msra.mxu0 %v539_v12 }
  0x73   :  { %959 = vmatprep.subr.mxu0 %v538_v13 }
  0x74   :  { %960 = vmatpush3.msra.mxu0 %v538_v13 }
  0x75   :  { %961 = vmatprep.subr.mxu0 %v537_v14 }
  0x76   :  { %962 = vmatpush3.msra.mxu0 %v537_v14 }
  0x77   :  { %963 = vmatprep.subr.mxu0 %v536_v15 }
  0x78   :  { %964 = vmatpush3.msra.mxu0 %v536_v15 }
 0x117   :  { %v863_v60 = vpop.f32.mrf.mxu0 }
 0x119   :  { %v238_v61 = vpop.f32.mrf.mxu0 }
 0x11a   :  { %909 = vmatprep.mubr.f32.mxu1 %v238_v61 }
 0x11b   :  { %v864_v62 = vpop.f32.mrf.mxu0 }
 0x11d   :  { %v241_v63 = vpop.f32.mrf.mxu0 }
 0x11e   :  { %910 = vmatmul.mubr.f32.vlgmr.msra.gmra.mxu1 %v241_v63 }
 0x11f   :  { %v867_v0 = vpop.f32.mrf.mxu0  ;;  %912 = vmatprep.mubr.f32.mxu1 %v863_v60  ;;  %1005 = vmatpush3.msra.mxu1 %v551_v48 }
 0x120   :  { %990 = vmatprep.subr.mxu1 %v550_v49 }
 0x121   :  { %v254_v1 = vpop.f32.mrf.mxu0  ;;  %1006 = vmatpush3.msra.mxu1 %v550_v49 }
 0x122   :  { %913 = vmatmul.mubr.f32.gmra.mxu1 %v864_v62  ;;  %991 = vmatprep.subr.mxu1 %v549_v50 }
 0x123   :  { %v868_v2 = vpop.f32.mrf.mxu0  ;;  %915 = vmatprep.mubr.f32.mxu1 %v254_v1  ;;  %1007 = vmatpush3.msra.mxu1 %v549_v50  ;;  %v1217_v1 = vld [vmem:[%s1246_s5] ss:$0 sm:$0xff]  ;;  %s1154_s5 = smov [#allocation11]  }
 0x124   :  { %992 = vmatprep.subr.mxu1 %v548_v51  ;;  %s741_s20 = sshll.u32 %s1154_s5, 4  ;;  %s742_s20 = int_to_ptr.vmem [resolvable:$true] %s741_s20 }
 0x125   :  { %v257_v3 = vpop.f32.mrf.mxu0  ;;  %1008 = vmatpush3.msra.mxu1 %v548_v51  ;;  %s1118_s21 = scalar_lea.vmem %s742_s20, 2048  ;;  %p1123_p7 = scmp.lt.s32.totalorder %s742_s20, %s742_s20 }
 0x126   :  { %916 = vmatmul.mubr.f32.gmra.mxu1 %v257_v3  ;;  %993 = vmatprep.subr.mxu1 %v547_v52  ;;  %p1119_p6 = scmp.ne.s32.totalorder %s742_s20, %s1118_s21  ;;  %p1124_p8 = scmp.lt.s32.totalorder %s1118_s21, %s1118_s21 }
 0x127   :  { %v871_v4 = vpop.f32.mrf.mxu0  ;;  %918 = vmatprep.mubr.f32.mxu1 %v867_v0  ;;  %1009 = vmatpush3.msra.mxu1 %v547_v52 }
 0x128   :  { %994 = vmatprep.subr.mxu1 %v546_v53  ;;  %p1125_p9 = por %p1124_p8, %p1123_p7 }
 0x129   :  { %v270_v5 = vpop.f32.mrf.mxu0  ;;  %1010 = vmatpush3.msra.mxu1 %v546_v53 }
 0x12a   :  { %919 = vmatmul.mubr.f32.gmra.mxu1 %v868_v2  ;;  %995 = vmatprep.subr.mxu1 %v545_v54  ;;  %p1126_p10 = pnand %p1125_p9, %p1119_p6 }
 0x12b   :  { %v872_v6 = vpop.f32.mrf.mxu0  ;;  %921 = vmatprep.mubr.f32.mxu1 %v270_v5  ;;  %1011 = vmatpush3.msra.mxu1 %v545_v54 }
 0x12c   :  { %996 = vmatprep.subr.mxu1 %v544_v55 }
 0x12d   :  { %v273_v7 = vpop.f32.mrf.mxu0  ;;  %1012 = vmatpush3.msra.mxu1 %v544_v55 }
 0x12e   :  { %922 = vmatmul.mubr.f32.gmra.mxu1 %v273_v7  ;;  %997 = vmatprep.subr.mxu1 %v543_v56 }
 0x12f   :  { %v875_v8 = vpop.f32.mrf.mxu0  ;;  %924 = vmatprep.mubr.f32.mxu1 %v871_v4  ;;  %1013 = vmatpush3.msra.mxu1 %v543_v56 }
 0x130   :  { %998 = vmatprep.subr.mxu1 %v542_v57 }
 0x131   :  { %v286_v9 = vpop.f32.mrf.mxu0  ;;  %1014 = vmatpush3.msra.mxu1 %v542_v57 }
 0x132   :  { %925 = vmatmul.mubr.f32.gmra.mxu1 %v872_v6  ;;  %999 = vmatprep.subr.mxu1 %v541_v58 }
 0x133   :  { %v876_v10 = vpop.f32.mrf.mxu0  ;;  %927 = vmatprep.mubr.f32.mxu1 %v286_v9  ;;  %1015 = vmatpush3.msra.mxu1 %v541_v58 }
 0x134   :  { %1000 = vmatprep.subr.mxu1 %v540_v59 }
 0x135   :  { %v289_v11 = vpop.f32.mrf.mxu0  ;;  %1016 = vmatpush3.msra.mxu1 %v540_v59 }
 0x136   :  { %928 = vmatmul.mubr.f32.gmra.mxu1 %v289_v11  ;;  %1001 = vmatprep.subr.mxu1 %v539_v12 }
 0x137   :  { %930 = vmatprep.mubr.f32.mxu1 %v875_v8  ;;  %1017 = vmatpush3.msra.mxu1 %v539_v12 }
 0x138   :  { %1002 = vmatprep.subr.mxu1 %v538_v13 }
 0x139   :  { %1018 = vmatpush3.msra.mxu1 %v538_v13 }
 0x13a   :  { %931 = vmatmul.mubr.f32.gmra.mxu1 %v876_v10  ;;  %1003 = vmatprep.subr.mxu1 %v537_v14 }
 0x13b   :  { %1019 = vmatpush3.msra.mxu1 %v537_v14 }
 0x13c   :  { %1004 = vmatprep.subr.mxu1 %v536_v15 }
 0x13d   :  { %1020 = vmatpush3.msra.mxu1 %v536_v15 }
 0x1de   :  { %v911_v17 = vpop.f32.mrf.mxu1 }
 0x1df   :  { %v447_v18 = vadd.f32 %v911_v17, %v763_v16 }
 0x1e0   :  { %v441_v19 = vpop.f32.mrf.mxu1 }
 0x1e1   :  { %v442_v20 = vadd.f32 %v763_v16, %v441_v19  ;;  %v521_v23 = vmax.f32 %v447_v18, 0.0 }
 0x1e2   :  { %v914_v21 = vpop.f32.mrf.mxu1 }
 0x1e3   :  { %v520_v22 = vmax.f32 %v442_v20, 0.0  ;;  %v457_v24 = vadd.f32 %v914_v21, %v763_v16 }
 0x1e4   :  { %v451_v25 = vpop.f32.mrf.mxu1 }
 0x1e5   :  { %v452_v26 = vadd.f32 %v763_v16, %v451_v25  ;;  %965 = vmatprep.mubr.f32.mxu0 %v520_v22  ;;  %v523_v29 = vmax.f32 %v457_v24, 0.0 }
 0x1e6   :  { %v917_v27 = vpop.f32.mrf.mxu1  ;;  %966 = vmatmul.mubr.f32.vlgmr.msra.gmra.mxu0 %v521_v23 }
 0x1e7   :  { %v522_v28 = vmax.f32 %v452_v26, 0.0  ;;  %v467_v30 = vadd.f32 %v917_v27, %v763_v16 }
 0x1e8   :  { %v461_v31 = vpop.f32.mrf.mxu1 }
 0x1e9   :  { %v462_v32 = vadd.f32 %v763_v16, %v461_v31  ;;  %968 = vmatprep.mubr.f32.mxu0 %v522_v28  ;;  %v525_v35 = vmax.f32 %v467_v30, 0.0 }
 0x1ea   :  { %v920_v33 = vpop.f32.mrf.mxu1  ;;  %969 = vmatmul.mubr.f32.gmra.mxu0 %v523_v29 }
 0x1eb   :  { %v524_v34 = vmax.f32 %v462_v32, 0.0  ;;  %v477_v36 = vadd.f32 %v920_v33, %v763_v16 }
 0x1ec   :  { %v471_v37 = vpop.f32.mrf.mxu1 }
 0x1ed   :  { %v472_v38 = vadd.f32 %v763_v16, %v471_v37  ;;  %971 = vmatprep.mubr.f32.mxu0 %v524_v34  ;;  %v527_v41 = vmax.f32 %v477_v36, 0.0 }
 0x1ee   :  { %v923_v39 = vpop.f32.mrf.mxu1  ;;  %972 = vmatmul.mubr.f32.gmra.mxu0 %v525_v35 }
 0x1ef   :  { %v526_v40 = vmax.f32 %v472_v38, 0.0  ;;  %v487_v42 = vadd.f32 %v923_v39, %v763_v16 }
 0x1f0   :  { %v481_v43 = vpop.f32.mrf.mxu1 }
 0x1f1   :  { %v482_v44 = vadd.f32 %v763_v16, %v481_v43  ;;  %974 = vmatprep.mubr.f32.mxu0 %v526_v40  ;;  %v529_v47 = vmax.f32 %v487_v42, 0.0 }
 0x1f2   :  { %v926_v45 = vpop.f32.mrf.mxu1  ;;  %975 = vmatmul.mubr.f32.gmra.mxu0 %v527_v41 }
 0x1f3   :  { %v528_v46 = vmax.f32 %v482_v44, 0.0  ;;  %v497_v48 = vadd.f32 %v926_v45, %v763_v16 }
 0x1f4   :  { %v491_v49 = vpop.f32.mrf.mxu1 }
 0x1f5   :  { %v492_v50 = vadd.f32 %v763_v16, %v491_v49  ;;  %977 = vmatprep.mubr.f32.mxu1 %v528_v46  ;;  %v531_v53 = vmax.f32 %v497_v48, 0.0 }
 0x1f6   :  { %v929_v51 = vpop.f32.mrf.mxu1  ;;  %978 = vmatmul.mubr.f32.vlgmr.msra.gmra.mxu1 %v529_v47 }
 0x1f7   :  { %v530_v52 = vmax.f32 %v492_v50, 0.0  ;;  %v507_v54 = vadd.f32 %v929_v51, %v763_v16 }
 0x1f8   :  { %v501_v55 = vpop.f32.mrf.mxu1 }
 0x1f9   :  { %v502_v56 = vadd.f32 %v763_v16, %v501_v55  ;;  %980 = vmatprep.mubr.f32.mxu1 %v530_v52  ;;  %v533_v59 = vmax.f32 %v507_v54, 0.0 }
 0x1fa   :  { %v932_v57 = vpop.f32.mrf.mxu1  ;;  %981 = vmatmul.mubr.f32.gmra.mxu1 %v531_v53 }
 0x1fb   :  { %v532_v58 = vmax.f32 %v502_v56, 0.0  ;;  %v517_v60 = vadd.f32 %v932_v57, %v763_v16 }
 0x1fc   :  { %v511_v61 = vpop.f32.mrf.mxu1 }
 0x1fd   :  { %v512_v62 = vadd.f32 %v763_v16, %v511_v61  ;;  %983 = vmatprep.mubr.f32.mxu1 %v532_v58  ;;  %v535_v0 = vmax.f32 %v517_v60, 0.0 }
 0x1fe   :  { %984 = vmatmul.mubr.f32.gmra.mxu1 %v533_v59 }
 0x1ff   :  { %v534_v63 = vmax.f32 %v512_v62, 0.0 }
 0x201   :  { %986 = vmatprep.mubr.f32.mxu1 %v534_v63 }
 0x202   :  { %987 = vmatmul.mubr.f32.gmra.mxu1 %v535_v0 }
 0x2a6   :  { %v967_v2 = vpop.f32.mrf.mxu0 }
 0x2a7   :  { %v631_v3 = vadd.f32 %v967_v2, %v1217_v1 }
 0x2a8   :  { %v625_v4 = vpop.f32.mrf.mxu0 }
 0x2a9   :  { %v705_v5 = vmax.f32 %v631_v3, 0.0  ;;  %v626_v6 = vadd.f32 %v1217_v1, %v625_v4 }
 0x2aa   :  { %v970_v7 = vpop.f32.mrf.mxu0 }
 0x2ab   :  { %721 = vst [vmem:[#allocation11 + $0x8] sm:$0xff] %v705_v5  ;;  %v704_v8 = vmax.f32 %v626_v6, 0.0  ;;  %v641_v9 = vadd.f32 %v970_v7, %v1217_v1 }
 0x2ac   :  { %v635_v10 = vpop.f32.mrf.mxu0 }
 0x2ad   :  { %720 = vst [vmem:[#allocation11] sm:$0xff] %v704_v8  ;;  %v707_v11 = vmax.f32 %v641_v9, 0.0  ;;  %v636_v12 = vadd.f32 %v1217_v1, %v635_v10 }
 0x2ae   :  { %v973_v13 = vpop.f32.mrf.mxu0 }
 0x2af   :  { %723 = vst [vmem:[#allocation11 + $0x18] sm:$0xff] %v707_v11  ;;  %v706_v14 = vmax.f32 %v636_v12, 0.0  ;;  %v651_v15 = vadd.f32 %v973_v13, %v1217_v1 }
 0x2b0   :  { %v645_v16 = vpop.f32.mrf.mxu0 }
 0x2b1   :  { %722 = vst [vmem:[#allocation11 + $0x10] sm:$0xff] %v706_v14  ;;  %v709_v17 = vmax.f32 %v651_v15, 0.0  ;;  %v646_v18 = vadd.f32 %v1217_v1, %v645_v16 }
 0x2b2   :  { %v976_v19 = vpop.f32.mrf.mxu0 }
 0x2b3   :  { %725 = vst [vmem:[#allocation11 + $0x28] sm:$0xff] %v709_v17  ;;  %v708_v20 = vmax.f32 %v646_v18, 0.0  ;;  %v661_v21 = vadd.f32 %v976_v19, %v1217_v1 }
 0x2b4   :  { %v655_v22 = vpop.f32.mrf.mxu0 }
 0x2b5   :  { %724 = vst [vmem:[#allocation11 + $0x20] sm:$0xff] %v708_v20  ;;  %v711_v23 = vmax.f32 %v661_v21, 0.0  ;;  %v656_v24 = vadd.f32 %v1217_v1, %v655_v22 }
 0x2b6   :  { %v979_v25 = vpop.f32.mrf.mxu1 }
 0x2b7   :  { %727 = vst [vmem:[#allocation11 + $0x38] sm:$0xff] %v711_v23  ;;  %v710_v26 = vmax.f32 %v656_v24, 0.0  ;;  %v671_v27 = vadd.f32 %v979_v25, %v1217_v1 }
 0x2b8   :  { %v665_v28 = vpop.f32.mrf.mxu1 }
 0x2b9   :  { %726 = vst [vmem:[#allocation11 + $0x30] sm:$0xff] %v710_v26  ;;  %v713_v29 = vmax.f32 %v671_v27, 0.0  ;;  %v666_v30 = vadd.f32 %v1217_v1, %v665_v28 }
 0x2ba   :  { %v982_v31 = vpop.f32.mrf.mxu1 }
 0x2bb   :  { %729 = vst [vmem:[#allocation11 + $0x48] sm:$0xff] %v713_v29  ;;  %v712_v32 = vmax.f32 %v666_v30, 0.0  ;;  %v681_v33 = vadd.f32 %v982_v31, %v1217_v1 }
 0x2bc   :  { %v675_v34 = vpop.f32.mrf.mxu1 }
 0x2bd   :  { %728 = vst [vmem:[#allocation11 + $0x40] sm:$0xff] %v712_v32  ;;  %v715_v35 = vmax.f32 %v681_v33, 0.0  ;;  %v676_v36 = vadd.f32 %v1217_v1, %v675_v34 }
 0x2be   :  { %v985_v37 = vpop.f32.mrf.mxu1 }
 0x2bf   :  { %731 = vst [vmem:[#allocation11 + $0x58] sm:$0xff] %v715_v35  ;;  %v714_v38 = vmax.f32 %v676_v36, 0.0  ;;  %v691_v39 = vadd.f32 %v985_v37, %v1217_v1 }
 0x2c0   :  { %v685_v40 = vpop.f32.mrf.mxu1 }
 0x2c1   :  { %730 = vst [vmem:[#allocation11 + $0x50] sm:$0xff] %v714_v38  ;;  %v717_v41 = vmax.f32 %v691_v39, 0.0  ;;  %v686_v42 = vadd.f32 %v1217_v1, %v685_v40 }
 0x2c2   :  { %v988_v43 = vpop.f32.mrf.mxu1 }
 0x2c3   :  { %733 = vst [vmem:[#allocation11 + $0x68] sm:$0xff] %v717_v41  ;;  %v716_v44 = vmax.f32 %v686_v42, 0.0  ;;  %v701_v45 = vadd.f32 %v988_v43, %v1217_v1 }
 0x2c4   :  { %v695_v46 = vpop.f32.mrf.mxu1 }
 0x2c5   :  { %732 = vst [vmem:[#allocation11 + $0x60] sm:$0xff] %v716_v44  ;;  %v719_v47 = vmax.f32 %v701_v45, 0.0  ;;  %v696_v48 = vadd.f32 %v1217_v1, %v695_v46 }
 0x2c7   :  { %735 = vst [vmem:[#allocation11 + $0x78] sm:$0xff] %v719_v47  ;;  %v718_v49 = vmax.f32 %v696_v48, 0.0 }
 0x2c9   :  { %734 = vst [vmem:[#allocation11 + $0x70] sm:$0xff] %v718_v49 }
 0x2ca   :  { %1129 = shalt.err (!%p1126_p10)
}
 0x2cb   :  { %747 = dma.vmem_to_hbm [thread:$0]  %s742_s20, 2048, %s1247_s6, [#allocation5], %s1147_s24, %s1147_s24, %s1148_s25  }
 0x2cc   :  { %1144 = dma.done.wait [#allocation5], 2048  }
 0x2cd   :  { %1145 = vsyncadd [#allocation5], 4294965248 }
 0x2ce   :  { %751 = vsyncpa [#allocation4], 1 }
 0x2cf   :  { %752 = vsyncpa [#allocation7], 1 }
 0x2d0   :  { %753 = vsyncpa [#allocation10], 1 }
 0x2d1   :  { %754 = vsyncpa [#allocation5], 1 }

</bundles_post_ra>
